<compile_context>
chip_gen: v7x
topology: tpu7x:2x2x1
jax: 0.10.0
libtpu: 0.0.40
codegen_flags: <defaults>
</compile_context>

<pallas_src>
import jax
import jax.numpy as jnp
import numpy as np
from jax import lax
from jax.experimental import pallas as pl
from jax.experimental.pallas import tpu as pltpu

EPS = 1e-5


def residual_block_forward(x, params, *, kernel_size, stride=1, padding=0):
    N, Cin, L = x.shape
    Cout = params["w1"].shape[0]
    K, s, pad = kernel_size, stride, padding
    use_downsample = (s != 1) or (Cin != Cout)

    cdiv = lambda a, b: -(-a // b)
    rup = lambda v, m: cdiv(v, m) * m

    L1 = (L + 2 * pad - K) // s + 1          # conv1 output length
    L2 = L1 + 2 * pad - K + 1                # conv2 output length (stride 1)
    Lds = (L - 1) // s + 1                   # 1x1 downsample output length
    if use_downsample:
        assert Lds == L2, "residual add needs matching lengths"
    else:
        assert L == L2, "residual add needs matching lengths"

    # Per-sample segment lengths of the lane-packed slabs.
    S1o = max(L1 + pad, L2, Lds, pad + cdiv(L + 2 * pad, s))   # output-side segment
    S1x = s * S1o                                              # input-side segment
    Wout = rup(N * S1o, 128)                                   # lane-dense output width
    Wmid = rup(Wout + K - 1, 128)                              # conv1-output slab width
    Wx = rup(max(s * (Wmid - 1) + K,
                 s * (Wout - 1) + (s + 1) * pad + 1,
                 N * S1x), 128)

    # ---- input slab (Cin, Wx): sample n's zero-padded signal starts at lane
    #      n*S1x + s*pad, its raw data at n*S1x + (s+1)*pad; everything else is 0.
    off = (s + 1) * pad
    x32 = x.astype(jnp.float32)
    seg = jnp.pad(x32, ((0, 0), (0, 0), (off, S1x - off - L)))      # (N, Cin, S1x)
    xslab = jnp.transpose(seg, (1, 0, 2)).reshape(Cin, N * S1x)
    xslab = jnp.pad(xslab, ((0, 0), (0, Wx - N * S1x)))

    # ---- lane-validity masks ({0,1} f32, built host-side)
    m1_np = np.zeros((1, Wmid), np.float32)
    m2_np = np.zeros((1, Wout), np.float32)
    for n in range(N):
        m1_np[0, n * S1o + pad: n * S1o + pad + L1] = 1.0
        m2_np[0, n * S1o: n * S1o + L2] = 1.0
    m1 = jnp.asarray(m1_np)
    m2 = jnp.asarray(m2_np)

    # ---- parameters in MXU-friendly layouts
    col = lambda v: jnp.asarray(v, jnp.float32).reshape(Cout, 1)
    w1_t = jnp.transpose(params["w1"].astype(jnp.float32), (2, 0, 1))   # (K, Cout, Cin)
    w2_t = jnp.transpose(params["w2"].astype(jnp.float32), (2, 0, 1))   # (K, Cout, Cout)
    if use_downsample:
        wd = params["wd"][:, :, 0].astype(jnp.float32)                  # (Cout, Cin)
        bd, gd, bed = col(params["bd"]), col(params["gd"]), col(params["bed"])
    else:
        wd = jnp.zeros((Cout, Cin), jnp.float32)
        bd = gd = bed = jnp.zeros((Cout, 1), jnp.float32)

    inv1 = 1.0 / float(N * L1)
    inv2 = 1.0 / float(N * L2)
    invd = 1.0 / float(N * Lds)

    def win(ref, start, width):
        # Strided window straight from the ref (load-path stride, no value permutes).
        if s > 1:
            return ref[:, pl.ds(start, width, stride=s)]
        return ref[:, pl.ds(start, width)]

    def kernel(x_ref, m1_ref, m2_ref,
               w1_ref, b1_ref, g1_ref, be1_ref,
               w2_ref, b2_ref, g2_ref, be2_ref,
               wd_ref, bd_ref, gd_ref, bed_ref,
               out_ref):
        m1v = m1_ref[...]          # (1, Wmid)
        m2v = m2_ref[...]          # (1, Wout)

        # ---- conv1: K taps, each one whole-batch MXU matmul (batch folded into lanes)
        h1 = jnp.dot(w1_ref[0], win(x_ref, 0, Wmid), preferred_element_type=jnp.float32)
        for k in range(1, K):
            h1 = h1 + jnp.dot(w1_ref[k], win(x_ref, k, Wmid),
                              preferred_element_type=jnp.float32)
        h1 = h1 + b1_ref[...]

        # ---- bn1 (training-mode batch stats, single fused pass) + relu
        h1m = h1 * m1v
        mu1 = jnp.sum(h1m, axis=-1, keepdims=True) * inv1
        var1 = jnp.sum(h1m * h1m, axis=-1, keepdims=True) * inv1 - mu1 * mu1
        h2 = jnp.maximum((h1 - mu1) * lax.rsqrt(var1 + EPS) * g1_ref[...] + be1_ref[...],
                         0.0)
        h2 = h2 * m1v              # zero inter-sample lanes == implicit conv2 zero-pad

        # ---- conv2 (stride 1): K shifted static lane slices of the slab value
        h3 = jnp.dot(w2_ref[0], h2[:, 0:Wout], preferred_element_type=jnp.float32)
        for k in range(1, K):
            h3 = h3 + jnp.dot(w2_ref[k], h2[:, k:k + Wout],
                              preferred_element_type=jnp.float32)
        h3 = h3 + b2_ref[...]

        h3m = h3 * m2v
        mu2 = jnp.sum(h3m, axis=-1, keepdims=True) * inv2
        var2 = jnp.sum(h3m * h3m, axis=-1, keepdims=True) * inv2 - mu2 * mu2
        main = (h3 - mu2) * lax.rsqrt(var2 + EPS) * g2_ref[...] + be2_ref[...]

        # ---- shortcut branch
        if use_downsample:
            xs = win(x_ref, (s + 1) * pad, Wout)        # whole-batch 1x1-conv input
            hd = jnp.dot(wd_ref[...], xs, preferred_element_type=jnp.float32) + bd_ref[...]
            hdm = hd * m2v
            mud = jnp.sum(hdm, axis=-1, keepdims=True) * invd
            vard = jnp.sum(hdm * hdm, axis=-1, keepdims=True) * invd - mud * mud
            ident = (hd - mud) * lax.rsqrt(vard + EPS) * gd_ref[...] + bed_ref[...]
        else:
            ident = x_ref[:, pl.ds(2 * pad, Wout)]      # whole-batch identity read

        out_ref[...] = jnp.maximum(main + ident, 0.0)   # lane-dense unmasked store

    args = (xslab, m1, m2,
            w1_t, col(params["b1"]), col(params["g1"]), col(params["be1"]),
            w2_t, col(params["b2"]), col(params["g2"]), col(params["be2"]),
            wd, bd, gd, bed)

    out2d = pl.pallas_call(
        kernel,
        out_shape=jax.ShapeDtypeStruct((Cout, Wout), jnp.float32),
        in_specs=[pl.BlockSpec(memory_space=pltpu.MemorySpace.VMEM) for _ in args],
        out_specs=pl.BlockSpec(memory_space=pltpu.MemorySpace.VMEM),
    )(*args)

    # Wrapper-side layout plumbing back to PyTorch's (N, Cout, L_out).
    out = out2d[:, : N * S1o].reshape(Cout, N, S1o)[:, :, :L2]
    return jnp.transpose(out, (1, 0, 2))


def residual_block_reference(x, params, *, kernel_size, stride=1, padding=0):
    """Pure-JAX reference (training-mode BN), for correctness checking."""
    def conv1d(h, w, b, s, p):
        dn = lax.conv_dimension_numbers(h.shape, w.shape, ('NCH', 'OIH', 'NCH'))
        y = lax.conv_general_dilated(h, w, (s,), [(p, p)], dimension_numbers=dn)
        return y + b[None, :, None]

    def bn(h, g, be):
        m = jnp.mean(h, axis=(0, 2), keepdims=True)
        v = jnp.mean((h - m) ** 2, axis=(0, 2), keepdims=True)
        return (h - m) / jnp.sqrt(v + EPS) * g[None, :, None] + be[None, :, None]

    Cin, Cout = x.shape[1], params["w1"].shape[0]
    out = conv1d(x, params["w1"], params["b1"], stride, padding)
    out = jax.nn.relu(bn(out, params["g1"], params["be1"]))
    out = conv1d(out, params["w2"], params["b2"], 1, padding)
    out = bn(out, params["g2"], params["be2"])
    if stride != 1 or Cin != Cout:
        ident = conv1d(x, params["wd"], params["bd"], stride, 0)
        ident = bn(ident, params["gd"], params["bed"])
    else:
        ident = x
    return jax.nn.relu(out + ident)


if __name__ == "__main__":
    key = jax.random.PRNGKey(0)

    def make_params(k, Cin, Cout, K):
        k1, k2, k3, k4, k5, k6 = jax.random.split(k, 6)
        return {
            "w1": 0.3 * jax.random.normal(k1, (Cout, Cin, K), jnp.float32),
            "b1": 0.1 * jax.random.normal(k2, (Cout,), jnp.float32),
            "g1": jnp.ones((Cout,), jnp.float32),
            "be1": jnp.zeros((Cout,), jnp.float32),
            "w2": 0.3 * jax.random.normal(k3, (Cout, Cout, K), jnp.float32),
            "b2": 0.1 * jax.random.normal(k4, (Cout,), jnp.float32),
            "g2": jnp.ones((Cout,), jnp.float32),
            "be2": jnp.zeros((Cout,), jnp.float32),
            "wd": 0.3 * jax.random.normal(k5, (Cout, Cin, 1), jnp.float32),
            "bd": 0.1 * jax.random.normal(k6, (Cout,), jnp.float32),
            "gd": jnp.ones((Cout,), jnp.float32),
            "bed": jnp.zeros((Cout,), jnp.float32),
        }

    N, L, K, stride, padding = 2, 16, 3, 1, 1
    kA, kB, kxA, kxB = jax.random.split(key, 4)

    # Config A: Cin != Cout -> downsample branch (1x1 conv + BN) active.
    Cin, Cout = 4, 8
    pA = make_params(kA, Cin, Cout, K)
    xA = jax.random.normal(kxA, (N, Cin, L), jnp.float32)
    outA = jax.block_until_ready(
        residual_block_forward(xA, pA, kernel_size=K, stride=stride, padding=padding))
    refA = residual_block_reference(xA, pA, kernel_size=K, stride=stride, padding=padding)
    np.testing.assert_allclose(np.asarray(outA), np.asarray(refA), rtol=1e-4, atol=1e-4)

    # Config B: Cin == Cout, stride 1 -> plain identity shortcut.
    Cin2 = Cout
    pB = make_params(kB, Cin2, Cout, K)
    xB = jax.random.normal(kxB, (N, Cin2, L), jnp.float32)
    outB = jax.block_until_ready(
        residual_block_forward(xB, pB, kernel_size=K, stride=stride, padding=padding))
    refB = residual_block_reference(xB, pB, kernel_size=K, stride=stride, padding=padding)
    np.testing.assert_allclose(np.asarray(outB), np.asarray(refB), rtol=1e-4, atol=1e-4)

    print("KERNEL_OK")
</pallas_src>

<mosaic_0001>
module attributes {stable_mosaic.version = 11 : i64} {
  func.func @kernel(%arg0: memref<4x384xf32, #tpu.memory_space<vmem>>, %arg1: memref<1x256xf32, #tpu.memory_space<vmem>>, %arg2: memref<1x128xf32, #tpu.memory_space<vmem>>, %arg3: memref<3x8x4xf32, #tpu.memory_space<vmem>>, %arg4: memref<8x1xf32, #tpu.memory_space<vmem>>, %arg5: memref<8x1xf32, #tpu.memory_space<vmem>>, %arg6: memref<8x1xf32, #tpu.memory_space<vmem>>, %arg7: memref<3x8x8xf32, #tpu.memory_space<vmem>>, %arg8: memref<8x1xf32, #tpu.memory_space<vmem>>, %arg9: memref<8x1xf32, #tpu.memory_space<vmem>>, %arg10: memref<8x1xf32, #tpu.memory_space<vmem>>, %arg11: memref<8x4xf32, #tpu.memory_space<vmem>>, %arg12: memref<8x1xf32, #tpu.memory_space<vmem>>, %arg13: memref<8x1xf32, #tpu.memory_space<vmem>>, %arg14: memref<8x1xf32, #tpu.memory_space<vmem>>, %arg15: memref<8x128xf32, #tpu.memory_space<vmem>>) attributes {dimension_semantics = [], scalar_prefetch = 0 : i64, scratch_operands = 0 : i64, tpu.core_type = #tpu.core_type<tc>} {
    %c0 = arith.constant 0 : index
    %c0_0 = arith.constant 0 : index
    %0 = vector.load %arg1[%c0, %c0_0] : memref<1x256xf32, #tpu.memory_space<vmem>>, vector<1x256xf32>
    %c0_1 = arith.constant 0 : index
    %c0_2 = arith.constant 0 : index
    %1 = vector.load %arg2[%c0_1, %c0_2] : memref<1x128xf32, #tpu.memory_space<vmem>>, vector<1x128xf32>
    %c0_3 = arith.constant 0 : index
    %c0_4 = arith.constant 0 : index
    %c0_5 = arith.constant 0 : index
    %2 = vector.load %arg3[%c0_3, %c0_4, %c0_5] : memref<3x8x4xf32, #tpu.memory_space<vmem>>, vector<1x8x4xf32>
    %3 = vector.shape_cast %2 : vector<1x8x4xf32> to vector<8x4xf32>
    %c0_6 = arith.constant 0 : index
    %c0_7 = arith.constant 0 : index
    %4 = vector.load %arg0[%c0_6, %c0_7] : memref<4x384xf32, #tpu.memory_space<vmem>>, vector<4x256xf32>
    %cst = arith.constant dense<0.000000e+00> : vector<8x256xf32>
    %5 = tpu.matmul %3, %4, %cst {dimension_numbers = #tpu.dot_dimension_numbers<[1], [0], [0], [1], [0, 0, 1, 1], [], []>} : vector<8x4xf32>, vector<4x256xf32>, vector<8x256xf32> -> vector<8x256xf32>
    %c1 = arith.constant 1 : index
    %c0_8 = arith.constant 0 : index
    %c0_9 = arith.constant 0 : index
    %6 = vector.load %arg3[%c1, %c0_8, %c0_9] : memref<3x8x4xf32, #tpu.memory_space<vmem>>, vector<1x8x4xf32>
    %7 = vector.shape_cast %6 : vector<1x8x4xf32> to vector<8x4xf32>
    %c0_10 = arith.constant 0 : index
    %c1_11 = arith.constant 1 : index
    %8 = vector.load %arg0[%c0_10, %c1_11] : memref<4x384xf32, #tpu.memory_space<vmem>>, vector<4x256xf32>
    %cst_12 = arith.constant dense<0.000000e+00> : vector<8x256xf32>
    %9 = tpu.matmul %7, %8, %cst_12 {dimension_numbers = #tpu.dot_dimension_numbers<[1], [0], [0], [1], [0, 0, 1, 1], [], []>} : vector<8x4xf32>, vector<4x256xf32>, vector<8x256xf32> -> vector<8x256xf32>
    %10 = arith.addf %5, %9 : vector<8x256xf32>
    %c2 = arith.constant 2 : index
    %c0_13 = arith.constant 0 : index
    %c0_14 = arith.constant 0 : index
    %11 = vector.load %arg3[%c2, %c0_13, %c0_14] : memref<3x8x4xf32, #tpu.memory_space<vmem>>, vector<1x8x4xf32>
    %12 = vector.shape_cast %11 : vector<1x8x4xf32> to vector<8x4xf32>
    %c0_15 = arith.constant 0 : index
    %c2_16 = arith.constant 2 : index
    %13 = vector.load %arg0[%c0_15, %c2_16] : memref<4x384xf32, #tpu.memory_space<vmem>>, vector<4x256xf32>
    %cst_17 = arith.constant dense<0.000000e+00> : vector<8x256xf32>
    %14 = tpu.matmul %12, %13, %cst_17 {dimension_numbers = #tpu.dot_dimension_numbers<[1], [0], [0], [1], [0, 0, 1, 1], [], []>} : vector<8x4xf32>, vector<4x256xf32>, vector<8x256xf32> -> vector<8x256xf32>
    %15 = arith.addf %10, %14 : vector<8x256xf32>
    %c0_18 = arith.constant 0 : index
    %c0_19 = arith.constant 0 : index
    %16 = vector.load %arg4[%c0_18, %c0_19] : memref<8x1xf32, #tpu.memory_space<vmem>>, vector<8x1xf32>
    %17 = vector.broadcast %16 : vector<8x1xf32> to vector<8x256xf32>
    %18 = arith.addf %15, %17 : vector<8x256xf32>
    %19 = vector.broadcast %0 : vector<1x256xf32> to vector<8x256xf32>
    %20 = arith.mulf %18, %19 : vector<8x256xf32>
    %cst_20 = arith.constant dense<0.000000e+00> : vector<8xf32>
    %21 = vector.multi_reduction <add>, %20, %cst_20 [1] : vector<8x256xf32> to vector<8xf32>
    %22 = vector.shape_cast %21 : vector<8xf32> to vector<8x1xf32>
    %cst_21 = arith.constant 3.125000e-02 : f32
    %23 = vector.broadcast %cst_21 : f32 to vector<8x1xf32>
    %24 = arith.mulf %22, %23 : vector<8x1xf32>
    %25 = arith.mulf %20, %20 : vector<8x256xf32>
    %cst_22 = arith.constant dense<0.000000e+00> : vector<8xf32>
    %26 = vector.multi_reduction <add>, %25, %cst_22 [1] : vector<8x256xf32> to vector<8xf32>
    %27 = vector.shape_cast %26 : vector<8xf32> to vector<8x1xf32>
    %cst_23 = arith.constant 3.125000e-02 : f32
    %28 = vector.broadcast %cst_23 : f32 to vector<8x1xf32>
    %29 = arith.mulf %27, %28 : vector<8x1xf32>
    %30 = arith.mulf %24, %24 : vector<8x1xf32>
    %31 = arith.subf %29, %30 : vector<8x1xf32>
    %32 = vector.broadcast %24 : vector<8x1xf32> to vector<8x256xf32>
    %33 = arith.subf %18, %32 : vector<8x256xf32>
    %cst_24 = arith.constant 9.99999974E-6 : f32
    %34 = vector.broadcast %cst_24 : f32 to vector<8x1xf32>
    %35 = arith.addf %31, %34 : vector<8x1xf32>
    %36 = math.rsqrt %35 : vector<8x1xf32>
    %37 = vector.broadcast %36 : vector<8x1xf32> to vector<8x256xf32>
    %38 = arith.mulf %33, %37 : vector<8x256xf32>
    %c0_25 = arith.constant 0 : index
    %c0_26 = arith.constant 0 : index
    %39 = vector.load %arg5[%c0_25, %c0_26] : memref<8x1xf32, #tpu.memory_space<vmem>>, vector<8x1xf32>
    %40 = vector.broadcast %39 : vector<8x1xf32> to vector<8x256xf32>
    %41 = arith.mulf %38, %40 : vector<8x256xf32>
    %c0_27 = arith.constant 0 : index
    %c0_28 = arith.constant 0 : index
    %42 = vector.load %arg6[%c0_27, %c0_28] : memref<8x1xf32, #tpu.memory_space<vmem>>, vector<8x1xf32>
    %43 = vector.broadcast %42 : vector<8x1xf32> to vector<8x256xf32>
    %44 = arith.addf %41, %43 : vector<8x256xf32>
    %cst_29 = arith.constant 0.000000e+00 : f32
    %45 = vector.broadcast %cst_29 : f32 to vector<8x256xf32>
    %46 = arith.maximumf %44, %45 : vector<8x256xf32>
    %47 = vector.broadcast %0 : vector<1x256xf32> to vector<8x256xf32>
    %48 = arith.mulf %46, %47 : vector<8x256xf32>
    %c0_30 = arith.constant 0 : index
    %c0_31 = arith.constant 0 : index
    %c0_32 = arith.constant 0 : index
    %49 = vector.load %arg7[%c0_30, %c0_31, %c0_32] : memref<3x8x8xf32, #tpu.memory_space<vmem>>, vector<1x8x8xf32>
    %50 = vector.shape_cast %49 : vector<1x8x8xf32> to vector<8x8xf32>
    %51 = vector.extract_strided_slice %48 {offsets = [0, 0], sizes = [8, 128], strides = [1, 1]} : vector<8x256xf32> to vector<8x128xf32>
    %cst_33 = arith.constant dense<0.000000e+00> : vector<8x128xf32>
    %52 = tpu.matmul %50, %51, %cst_33 {dimension_numbers = #tpu.dot_dimension_numbers<[1], [0], [0], [1], [0, 0, 1, 1], [], []>} : vector<8x8xf32>, vector<8x128xf32>, vector<8x128xf32> -> vector<8x128xf32>
    %c1_34 = arith.constant 1 : index
    %c0_35 = arith.constant 0 : index
    %c0_36 = arith.constant 0 : index
    %53 = vector.load %arg7[%c1_34, %c0_35, %c0_36] : memref<3x8x8xf32, #tpu.memory_space<vmem>>, vector<1x8x8xf32>
    %54 = vector.shape_cast %53 : vector<1x8x8xf32> to vector<8x8xf32>
    %55 = vector.extract_strided_slice %48 {offsets = [0, 1], sizes = [8, 128], strides = [1, 1]} : vector<8x256xf32> to vector<8x128xf32>
    %cst_37 = arith.constant dense<0.000000e+00> : vector<8x128xf32>
    %56 = tpu.matmul %54, %55, %cst_37 {dimension_numbers = #tpu.dot_dimension_numbers<[1], [0], [0], [1], [0, 0, 1, 1], [], []>} : vector<8x8xf32>, vector<8x128xf32>, vector<8x128xf32> -> vector<8x128xf32>
    %57 = arith.addf %52, %56 : vector<8x128xf32>
    %c2_38 = arith.constant 2 : index
    %c0_39 = arith.constant 0 : index
    %c0_40 = arith.constant 0 : index
    %58 = vector.load %arg7[%c2_38, %c0_39, %c0_40] : memref<3x8x8xf32, #tpu.memory_space<vmem>>, vector<1x8x8xf32>
    %59 = vector.shape_cast %58 : vector<1x8x8xf32> to vector<8x8xf32>
    %60 = vector.extract_strided_slice %48 {offsets = [0, 2], sizes = [8, 128], strides = [1, 1]} : vector<8x256xf32> to vector<8x128xf32>
    %cst_41 = arith.constant dense<0.000000e+00> : vector<8x128xf32>
    %61 = tpu.matmul %59, %60, %cst_41 {dimension_numbers = #tpu.dot_dimension_numbers<[1], [0], [0], [1], [0, 0, 1, 1], [], []>} : vector<8x8xf32>, vector<8x128xf32>, vector<8x128xf32> -> vector<8x128xf32>
    %62 = arith.addf %57, %61 : vector<8x128xf32>
    %c0_42 = arith.constant 0 : index
    %c0_43 = arith.constant 0 : index
    %63 = vector.load %arg8[%c0_42, %c0_43] : memref<8x1xf32, #tpu.memory_space<vmem>>, vector<8x1xf32>
    %64 = vector.broadcast %63 : vector<8x1xf32> to vector<8x128xf32>
    %65 = arith.addf %62, %64 : vector<8x128xf32>
    %66 = vector.broadcast %1 : vector<1x128xf32> to vector<8x128xf32>
    %67 = arith.mulf %65, %66 : vector<8x128xf32>
    %cst_44 = arith.constant dense<0.000000e+00> : vector<8xf32>
    %68 = vector.multi_reduction <add>, %67, %cst_44 [1] : vector<8x128xf32> to vector<8xf32>
    %69 = vector.shape_cast %68 : vector<8xf32> to vector<8x1xf32>
    %cst_45 = arith.constant 3.125000e-02 : f32
    %70 = vector.broadcast %cst_45 : f32 to vector<8x1xf32>
    %71 = arith.mulf %69, %70 : vector<8x1xf32>
    %72 = arith.mulf %67, %67 : vector<8x128xf32>
    %cst_46 = arith.constant dense<0.000000e+00> : vector<8xf32>
    %73 = vector.multi_reduction <add>, %72, %cst_46 [1] : vector<8x128xf32> to vector<8xf32>
    %74 = vector.shape_cast %73 : vector<8xf32> to vector<8x1xf32>
    %cst_47 = arith.constant 3.125000e-02 : f32
    %75 = vector.broadcast %cst_47 : f32 to vector<8x1xf32>
    %76 = arith.mulf %74, %75 : vector<8x1xf32>
    %77 = arith.mulf %71, %71 : vector<8x1xf32>
    %78 = arith.subf %76, %77 : vector<8x1xf32>
    %79 = vector.broadcast %71 : vector<8x1xf32> to vector<8x128xf32>
    %80 = arith.subf %65, %79 : vector<8x128xf32>
    %cst_48 = arith.constant 9.99999974E-6 : f32
    %81 = vector.broadcast %cst_48 : f32 to vector<8x1xf32>
    %82 = arith.addf %78, %81 : vector<8x1xf32>
    %83 = math.rsqrt %82 : vector<8x1xf32>
    %84 = vector.broadcast %83 : vector<8x1xf32> to vector<8x128xf32>
    %85 = arith.mulf %80, %84 : vector<8x128xf32>
    %c0_49 = arith.constant 0 : index
    %c0_50 = arith.constant 0 : index
    %86 = vector.load %arg9[%c0_49, %c0_50] : memref<8x1xf32, #tpu.memory_space<vmem>>, vector<8x1xf32>
    %87 = vector.broadcast %86 : vector<8x1xf32> to vector<8x128xf32>
    %88 = arith.mulf %85, %87 : vector<8x128xf32>
    %c0_51 = arith.constant 0 : index
    %c0_52 = arith.constant 0 : index
    %89 = vector.load %arg10[%c0_51, %c0_52] : memref<8x1xf32, #tpu.memory_space<vmem>>, vector<8x1xf32>
    %90 = vector.broadcast %89 : vector<8x1xf32> to vector<8x128xf32>
    %91 = arith.addf %88, %90 : vector<8x128xf32>
    %c0_53 = arith.constant 0 : index
    %c2_54 = arith.constant 2 : index
    %92 = vector.load %arg0[%c0_53, %c2_54] : memref<4x384xf32, #tpu.memory_space<vmem>>, vector<4x128xf32>
    %c0_55 = arith.constant 0 : index
    %c0_56 = arith.constant 0 : index
    %93 = vector.load %arg11[%c0_55, %c0_56] : memref<8x4xf32, #tpu.memory_space<vmem>>, vector<8x4xf32>
    %cst_57 = arith.constant dense<0.000000e+00> : vector<8x128xf32>
    %94 = tpu.matmul %93, %92, %cst_57 {dimension_numbers = #tpu.dot_dimension_numbers<[1], [0], [0], [1], [0, 0, 1, 1], [], []>} : vector<8x4xf32>, vector<4x128xf32>, vector<8x128xf32> -> vector<8x128xf32>
    %c0_58 = arith.constant 0 : index
    %c0_59 = arith.constant 0 : index
    %95 = vector.load %arg12[%c0_58, %c0_59] : memref<8x1xf32, #tpu.memory_space<vmem>>, vector<8x1xf32>
    %96 = vector.broadcast %95 : vector<8x1xf32> to vector<8x128xf32>
    %97 = arith.addf %94, %96 : vector<8x128xf32>
    %98 = vector.broadcast %1 : vector<1x128xf32> to vector<8x128xf32>
    %99 = arith.mulf %97, %98 : vector<8x128xf32>
    %cst_60 = arith.constant dense<0.000000e+00> : vector<8xf32>
    %100 = vector.multi_reduction <add>, %99, %cst_60 [1] : vector<8x128xf32> to vector<8xf32>
    %101 = vector.shape_cast %100 : vector<8xf32> to vector<8x1xf32>
    %cst_61 = arith.constant 3.125000e-02 : f32
    %102 = vector.broadcast %cst_61 : f32 to vector<8x1xf32>
    %103 = arith.mulf %101, %102 : vector<8x1xf32>
    %104 = arith.mulf %99, %99 : vector<8x128xf32>
    %cst_62 = arith.constant dense<0.000000e+00> : vector<8xf32>
    %105 = vector.multi_reduction <add>, %104, %cst_62 [1] : vector<8x128xf32> to vector<8xf32>
    %106 = vector.shape_cast %105 : vector<8xf32> to vector<8x1xf32>
    %cst_63 = arith.constant 3.125000e-02 : f32
    %107 = vector.broadcast %cst_63 : f32 to vector<8x1xf32>
    %108 = arith.mulf %106, %107 : vector<8x1xf32>
    %109 = arith.mulf %103, %103 : vector<8x1xf32>
    %110 = arith.subf %108, %109 : vector<8x1xf32>
    %111 = vector.broadcast %103 : vector<8x1xf32> to vector<8x128xf32>
    %112 = arith.subf %97, %111 : vector<8x128xf32>
    %cst_64 = arith.constant 9.99999974E-6 : f32
    %113 = vector.broadcast %cst_64 : f32 to vector<8x1xf32>
    %114 = arith.addf %110, %113 : vector<8x1xf32>
    %115 = math.rsqrt %114 : vector<8x1xf32>
    %116 = vector.broadcast %115 : vector<8x1xf32> to vector<8x128xf32>
    %117 = arith.mulf %112, %116 : vector<8x128xf32>
    %c0_65 = arith.constant 0 : index
    %c0_66 = arith.constant 0 : index
    %118 = vector.load %arg13[%c0_65, %c0_66] : memref<8x1xf32, #tpu.memory_space<vmem>>, vector<8x1xf32>
    %119 = vector.broadcast %118 : vector<8x1xf32> to vector<8x128xf32>
    %120 = arith.mulf %117, %119 : vector<8x128xf32>
    %c0_67 = arith.constant 0 : index
    %c0_68 = arith.constant 0 : index
    %121 = vector.load %arg14[%c0_67, %c0_68] : memref<8x1xf32, #tpu.memory_space<vmem>>, vector<8x1xf32>
    %122 = vector.broadcast %121 : vector<8x1xf32> to vector<8x128xf32>
    %123 = arith.addf %120, %122 : vector<8x128xf32>
    %124 = arith.addf %91, %123 : vector<8x128xf32>
    %cst_69 = arith.constant 0.000000e+00 : f32
    %125 = vector.broadcast %cst_69 : f32 to vector<8x128xf32>
    %126 = arith.maximumf %124, %125 : vector<8x128xf32>
    %c0_70 = arith.constant 0 : index
    %c0_71 = arith.constant 0 : index
    %127 = vector.load %arg15[%c0_70, %c0_71] : memref<8x128xf32, #tpu.memory_space<vmem>>, vector<8x128xf32>
    tpu.vector_store %arg15[%c0_70, %c0_71], %126 {strides = array<i32>} : memref<8x128xf32, #tpu.memory_space<vmem>>, vector<8x128xf32>,
    return
  }
}

</mosaic_0001>

<bundles_post_ra>
// kernel: tpu_custom_call.1
= control target key start
LH: loop header
LB: loop body
LE: loop exit
PB: predicated region body
PF: predicated region fallthrough
CT: control target
= control target key end

     0   :  { %s892_s20 = smov 127   ;;  %v893_v2 = vmov 0.0   ;;  %s1115_s0 = inlined_call_operand.vmem [shape: f32[4,384], index: 0, kind: input, shape index: {}]   ;;  %s1116_s1 = inlined_call_operand.vmem [shape: f32[1,256], index: 1, kind: input, shape index: {}]   ;;  %s1117_s2 = inlined_call_operand.vmem [shape: f32[1,128], index: 2, kind: input, shape index: {}]   ;;  %s1118_s3 = inlined_call_operand.vmem [shape: f32[3,8,4], index: 3, kind: input, shape index: {}]   ;;  %s1119_s4 = inlined_call_operand.vmem [shape: f32[8,1], index: 4, kind: input, shape index: {}]   ;;  %s1120_s5 = inlined_call_operand.vmem [shape: f32[8,1], index: 5, kind: input, shape index: {}]   ;;  %s1121_s6 = inlined_call_operand.vmem [shape: f32[8,1], index: 6, kind: input, shape index: {}]   ;;  %s1122_s7 = inlined_call_operand.vmem [shape: f32[3,8,8], index: 7, kind: input, shape index: {}]   ;;  %s1123_s8 = inlined_call_operand.vmem [shape: f32[8,1], index: 8, kind: input, shape index: {}]   ;;  %s1124_s9 = inlined_call_operand.vmem [shape: f32[8,1], index: 9, kind: input, shape index: {}]   ;;  %s1125_s10 = inlined_call_operand.vmem [shape: f32[8,1], index: 10, kind: input, shape index: {}]   ;;  %s1126_s11 = inlined_call_operand.vmem [shape: f32[8,4], index: 11, kind: input, shape index: {}]   ;;  %s1127_s12 = inlined_call_operand.vmem [shape: f32[8,1], index: 12, kind: input, shape index: {}]   ;;  %s1128_s13 = inlined_call_operand.vmem [shape: f32[8,1], index: 13, kind: input, shape index: {}]   ;;  %s1129_s14 = inlined_call_operand.vmem [shape: f32[8,1], index: 14, kind: input, shape index: {}]   ;;  %s1130_s15 = inlined_call_operand.hbm [shape: f32[8,128], index: 15, kind: output, shape index: {}]  }
   0x1   :  { %v981_v0 = vld [vmem:[%s1115_s0] sm:$0xff]  ;;  %144 = vmatprep.mubr.f32.mxu0 %v893_v2  ;;  %829 = vmatprep.subr.mxu1 %v893_v2 }
   0x2   :  { %62 = vrot.lane.b32.xlu1 %v981_v0, %s892_s20  ;;  %v987_v1 = vcombine.high %v981_v0, %v981_v0 }
   0x3   :  { %20 = vsyncpa [#allocation3], 0  ;;  %v58_v3 = vld [vmem:[%s1115_s0 + $0x8] sm:$0xf]  ;;  %s894_s23 = smov 126   ;;  %v327_v5 = vld [vmem:[%s1119_s4] sm:$0xff]  ;;  %v336_v20 = vlaneseq }
   0x4   :  { %64 = vrot.lane.b32.xlu0 %v987_v1, %s892_s20  ;;  %v234_v4 = vld [vmem:[%s1115_s0 + $0x8] sm:$0xf]  ;;  %v895_v6 = vmov 0   ;;  %vm68_vm0 = vcmask 1039360   ;;  %vm75_vm1 = vcmask 1043456   ;;  %vm71_vm2 = vcmask 31744  }
   0x5   :  { %859 = vset.pattern.permute.xlu0 %v895_v6  ;;  %860 = vset.pattern.permute.xlu1 %v895_v6  ;;  %v802_v11 = vld [vmem:[%s1118_s3 + $0x8] sm:$0xff]  ;;  %vm244_vm3 = vcmask 1031168   ;;  %v53_v17 = vld [vmem:[%s1118_s3] sm:$0xff]  ;;  %v809_v19 = vld [vmem:[%s1118_s3 + $0x10] sm:$0xff]  ;;  %v337_v21 = vshrl.u32 %v336_v20, 7  ;;  %vm896_vm4 = vmmov 0  }
   0x6   :  { %240 = vrot.lane.b32.xlu1 %v987_v1, %s894_s23  ;;  %v51_v23 = vld [vmem:[%s1116_s1] sm:$0x3]  ;;  %831 = vmatprep.mubr.msk.f32.mxu1 %vm896_vm4, %v893_v2  ;;  %vm397_vm5 = vcmask 64512  }
   0x7   :  { %v338_v22 = vsub.s32 0, %v337_v21  ;;  %v342_v24 = vsub.s32 1, %v337_v21  ;;  %v366_v38 = vld [vmem:[%s1120_s5] sm:$0xff] }
   0x8   :  { %66 = vrot.lane.b32.xlu0 %v58_v3, %s892_s20  ;;  %v374_v39 = vld [vmem:[%s1121_s6] sm:$0xff] }
   0x9   :  { %v339_v26 = vrot.slane %v51_v23, %v338_v22  ;;  %v343_v28 = vrot.slane %v51_v23, %v342_v24  ;;  %v626_v62 = vld [vmem:[%s1123_s8] sm:$0xff] }
   0xa   :  { %238 = vrot.lane.b32.xlu1 %v981_v0, %s894_s23  ;;  %v669_v63 = vld [vmem:[%s1127_s12] sm:$0xff] }
   0xb   :  { %v818_v21 = vld [vmem:[%s1117_s2] ss:$0 sm:$0xff] }
   0xc   :  { %242 = vrot.lane.b32.xlu0 %v234_v4, %s894_s23 }
  0x10   :  { %330 = vperm.xlu0 %859, %v327_v5  }
  0x74   :  { %v63_v8 = vpop.permute.xlu1 %62 }
  0x76   :  { %v65_v7 = vpop.permute.xlu0 %64 }
  0x77   :  { %v69_v13 = vsel %vm68_vm0, %v63_v8, %v65_v7 }
  0x78   :  { %v241_v12 = vpop.permute.xlu1 %240 }
  0x7a   :  { %v67_v9 = vpop.permute.xlu0 %66 }
  0x7b   :  { %v70_v10 = vsel %vm68_vm0, %v65_v7, %v67_v9  ;;  %v386_v7 = vld [vmem:[%s1122_s7] sm:$0xff] }
  0x7c   :  { %803 = vmatprep.subr.msk.mxu0 %vm75_vm1, %v70_v10  ;;  %v239_v16 = vpop.permute.xlu1 %238 }
  0x7d   :  { %804 = vmatpush1.msk.msra.mxu0 %vm75_vm1, %v69_v13  ;;  %v245_v18 = vsel %vm244_vm3, %v239_v16, %v241_v12 }
  0x7e   :  { %805 = vmatmul.mubr.msk.f32.vlgmr.msra.gmra.mrb[0].mxu0 %vm71_vm2, %v802_v11  ;;  %806 = vmatprep.subr.msk.mxu0 %vm75_vm1, %v987_v1  ;;  %v243_v14 = vpop.permute.xlu0 %242  ;;  %v816_v11 = vld [vmem:[%s1122_s7 + $0x10] sm:$0xff] }
  0x7f   :  { %807 = vmatpush1.msk.msra.mxu0 %vm75_vm1, %v981_v0  ;;  %v246_v15 = vsel %vm244_vm3, %v241_v12, %v243_v14  ;;  %224 = vmatprep.mubr.f32.mxu0 %v893_v2  ;;  %v668_v12 = vld [vmem:[%s1126_s11] sm:$0xff] }
  0x80   :  { %810 = vmatprep.subr.msk.mxu0 %vm75_vm1, %v246_v15 }
  0x86   :  { %808 = vmatmul.mubr.msk.f32.vlgmr.msra.gmra.mrb[0].mxu0 %vm71_vm2, %v53_v17 }
  0x87   :  { %811 = vmatpush1.msk.msra.mxu0 %vm75_vm1, %v245_v18  ;;  %318 = vmatprep.mubr.f32.mxu0 %v893_v2 }
  0x88   :  { %844 = vmatprep.subr.mxu0 %v893_v2 }
  0x8e   :  { %812 = vmatmul.mubr.msk.f32.vlgmr.msra.gmra.mrb[0].mxu0 %vm71_vm2, %v809_v19 }
  0x8f   :  { %v331_v25 = vpop.permute.xlu0 %330  ;;  %846 = vmatprep.mubr.msk.f32.mxu0 %vm896_vm4, %v893_v2 }
 0x161   :  { %v320_v27 = vpop.f32.mrb[0].mxu0 }
 0x162   :  { %v333_v29 = vadd.f32 %v331_v25, %v320_v27  ;;  %v322_v30 = vpop.f32.mrb[1].mxu0 }
 0x163   :  { %v334_v31 = vadd.f32 %v331_v25, %v322_v30 }
 0x164   :  { %v346_v32 = vmul.f32 %v339_v26, %v333_v29 }
 0x165   :  { %v347_v33 = vmul.f32 %v343_v28, %v334_v31 }
 0x166   :  { %v352_v34 = vmul.f32 %v346_v32, %v346_v32 }
 0x167   :  { %v348_v35 = vadd.f32 %v347_v33, %v346_v32  ;;  %v353_v36 = vmul.f32 %v347_v33, %v347_v33  ;;  %v653_v32 = vld [vmem:[%s1124_s9] sm:$0xff]  ;;  %s897_s9 = smov [#allocation2]  }
 0x168   :  { %v660_v33 = vld [vmem:[%s1125_s10] sm:$0xff]  ;;  %s794_s10 = sshll.u32 %s897_s9, 4  ;;  %s795_s10 = int_to_ptr.vmem [resolvable:$true] %s794_s10 }
 0x169   :  { %349 = vadd.xlane.f32.xlu1 %v348_v35  ;;  %v354_v37 = vadd.f32 %v353_v36, %v352_v34  ;;  %v778_v34 = vld [vmem:[%s1129_s14] sm:$0xff]  ;;  %p873_p1 = scmp.lt.s32.totalorder %s795_s10, %s795_s10 }
 0x16a   :  { %v771_v35 = vld [vmem:[%s1128_s13] sm:$0xff]  ;;  %s868_s13 = scalar_lea.vmem %s795_s10, 128 }
 0x16b   :  { %355 = vadd.xlane.f32.xlu0 %v354_v37  ;;  %p869_p0 = scmp.ne.s32.totalorder %s795_s10, %s868_s13  ;;  %p874_p2 = scmp.lt.s32.totalorder %s868_s13, %s868_s13 }
 0x16d   :  { %p875_p3 = por %p874_p2, %p873_p1 }
 0x16f   :  { %p876_p4 = pnand %p875_p3, %p869_p0 }
 0x17a   :  { %369 = vperm.xlu1 %860, %v366_v38  }
 0x181   :  { %377 = vperm.xlu0 %859, %v374_v39  }
 0x1f6   :  { %v350_v40 = vpop.xlane.xlu1 %349 }
 0x1f7   :  { %v351_v41 = vmul.f32 0.03125, %v350_v40 }
 0x1f8   :  { %v356_v42 = vpop.xlane.xlu0 %355 }
 0x1f9   :  { %v357_v43 = vmul.f32 0.03125, %v356_v42  ;;  %v358_v44 = vmul.f32 %v351_v41, %v351_v41  ;;  %v360_v47 = vsub.f32 %v333_v29, %v351_v41  ;;  %v361_v48 = vsub.f32 %v334_v31, %v351_v41 }
 0x1fa   :  { %v370_v50 = vpop.permute.xlu1 %369 }
 0x1fb   :  { %v359_v45 = vsub.f32 %v357_v43, %v358_v44 }
 0x1fd   :  { %v362_v46 = vadd.f32 1e-05, %v359_v45 }
 0x1ff   :  { %862 = vrsqrt.f32 %v362_v46 }
 0x200   :  { %v378_v55 = vpop.permute.xlu0 %377 }
 0x209   :  { %v863_v49 = vpop.eup %862 }
 0x20a   :  { %v364_v51 = vmul.f32 %v863_v49, %v360_v47  ;;  %v365_v52 = vmul.f32 %v863_v49, %v361_v48 }
 0x20c   :  { %v372_v53 = vmul.f32 %v370_v50, %v364_v51  ;;  %v373_v54 = vmul.f32 %v370_v50, %v365_v52 }
 0x20e   :  { %v380_v56 = vadd.f32 %v378_v55, %v372_v53  ;;  %v381_v57 = vadd.f32 %v378_v55, %v373_v54 }
 0x210   :  { %v382_v58 = vmax.f32 %v380_v56, 0.0  ;;  %v383_v59 = vmax.f32 %v381_v57, 0.0 }
 0x212   :  { %v384_v60 = vmul.f32 %v382_v58, %v339_v26  ;;  %v385_v61 = vmul.f32 %v383_v59, %v343_v28 }
 0x214   :  { %546 = vrot.lane.b32.xlu0 %v384_v60, %s894_s23  ;;  %391 = vrot.lane.b32.xlu1 %v384_v60, %s892_s20 }
 0x218   :  { %677 = vrot.lane.b32.xlu0 %v981_v0, %s894_s23  ;;  %393 = vrot.lane.b32.xlu1 %v385_v61, %s892_s20  ;;  %v813_v0 = vld [vmem:[%s1122_s7 + $0x8] sm:$0xff] }
 0x21c   :  { %629 = vperm.xlu0 %859, %v626_v62   ;;  %548 = vrot.lane.b32.xlu1 %v385_v61, %s894_s23 }
 0x220   :  { %679 = vrot.lane.b32.xlu1 %v987_v1, %s894_s23 }
 0x224   :  { %672 = vperm.xlu1 %860, %v669_v63  }
 0x286   :  { %v392_v3 = vpop.permute.xlu1 %391  ;;  %v547_v6 = vpop.permute.xlu0 %546 }
 0x28a   :  { %v394_v4 = vpop.permute.xlu1 %393  ;;  %v678_v9 = vpop.permute.xlu0 %677 }
 0x28b   :  { %v395_v5 = vsel %vm68_vm0, %v392_v3, %v394_v4 }
 0x28c   :  { %830 = vmatpush3.msra.mxu1 %v395_v5 }
 0x28d   :  { %832 = vmatmul.mubr.msk.f32.vlgmr.msra.gmra.mrb[0].mxu1 %vm397_vm5, %v813_v0  ;;  %834 = vmatprep.subr.mxu1 %v893_v2 }
 0x28e   :  { %835 = vmatpush3.msra.mxu1 %v384_v60  ;;  %v549_v1 = vpop.permute.xlu1 %548  ;;  %836 = vmatprep.mubr.msk.f32.mxu1 %vm896_vm4, %v893_v2 }
 0x28f   :  { %v550_v8 = vsel %vm244_vm3, %v547_v6, %v549_v1  ;;  %839 = vmatprep.subr.mxu1 %v893_v2 }
 0x291   :  { %837 = vmatmul.mubr.msk.f32.vlgmr.msra.gmra.mrb[2].mxu1 %vm397_vm5, %v386_v7 }
 0x292   :  { %840 = vmatpush3.msra.mxu1 %v550_v8  ;;  %v680_v10 = vpop.permute.xlu1 %679  ;;  %841 = vmatprep.mubr.msk.f32.mxu1 %vm896_vm4, %v893_v2 }
 0x293   :  { %v681_v13 = vsel %vm244_vm3, %v678_v9, %v680_v10 }
 0x294   :  { %845 = vmatpush3.msk.msra.mxu0 %vm75_vm1, %v681_v13 }
 0x295   :  { %842 = vmatmul.mubr.msk.f32.vlgmr.msra.gmra.mrb[4].mxu1 %vm397_vm5, %v816_v11  ;;  %847 = vmatmul.mubr.msk.f32.vlgmr.msra.gmra.mrb[2].mxu0 %vm71_vm2, %v668_v12 }
 0x29b   :  { %v630_v27 = vpop.permute.xlu0 %629 }
 0x2a3   :  { %v673_v18 = vpop.permute.xlu1 %672 }
 0x360   :  { %v467_v14 = vpop.f32.mrb[0].mxu1 }
 0x361   :  { %v833_v15 = vpop.f32.mrb[1].mxu1 }
 0x364   :  { %v540_v16 = vpop.f32.mrb[2].mxu1 }
 0x365   :  { %v541_v2 = vadd.f32 %v540_v16, %v467_v14  ;;  %v838_v17 = vpop.f32.mrb[3].mxu1 }
 0x368   :  { %v621_v19 = vpop.f32.mrb[4].mxu1  ;;  %v753_v20 = vpop.f32.mrb[2].mxu0 }
 0x369   :  { %v625_v22 = vadd.f32 %v621_v19, %v541_v2  ;;  %v754_v23 = vadd.f32 %v753_v20, %v673_v18  ;;  %v848_v24 = vpop.f32.mrb[3].mxu0  ;;  %v843_v25 = vpop.f32.mrb[5].mxu1 }
 0x36b   :  { %v757_v26 = vmul.f32 %v818_v21, %v754_v23  ;;  %v632_v28 = vadd.f32 %v630_v27, %v625_v22 }
 0x36d   :  { %758 = vadd.xlane.f32.xlu1 %v757_v26  ;;  %v761_v29 = vmul.f32 %v757_v26, %v757_v26  ;;  %v639_v30 = vmul.f32 %v818_v21, %v632_v28 }
 0x36f   :  { %762 = vadd.xlane.f32.xlu0 %v761_v29  ;;  %v643_v31 = vmul.f32 %v639_v30, %v639_v30 }
 0x373   :  { %640 = vadd.xlane.f32.xlu0 %v639_v30 }
 0x377   :  { %644 = vadd.xlane.f32.xlu0 %v643_v31 }
 0x37e   :  { %656 = vperm.xlu1 %860, %v653_v32  }
 0x382   :  { %663 = vperm.xlu1 %860, %v660_v33  }
 0x386   :  { %781 = vperm.xlu1 %860, %v778_v34  }
 0x38d   :  { %774 = vperm.xlu0 %859, %v771_v35  }
 0x3fa   :  { %v759_v36 = vpop.xlane.xlu1 %758 }
 0x3fb   :  { %v760_v37 = vmul.f32 0.03125, %v759_v36 }
 0x3fc   :  { %v763_v38 = vpop.xlane.xlu0 %762 }
 0x3fd   :  { %v765_v39 = vmul.f32 %v760_v37, %v760_v37  ;;  %v764_v40 = vmul.f32 0.03125, %v763_v38  ;;  %v767_v52 = vsub.f32 %v754_v23, %v760_v37 }
 0x3fe   :  { %v657_v50 = vpop.permute.xlu1 %656 }
 0x3ff   :  { %v766_v41 = vsub.f32 %v764_v40, %v765_v39 }
 0x400   :  { %v641_v42 = vpop.xlane.xlu0 %640 }
 0x401   :  { %v768_v43 = vadd.f32 1e-05, %v766_v41  ;;  %v642_v44 = vmul.f32 0.03125, %v641_v42 }
 0x402   :  { %v664_v54 = vpop.permute.xlu1 %663 }
 0x403   :  { %864 = vrsqrt.f32 %v768_v43  ;;  %v647_v46 = vmul.f32 %v642_v44, %v642_v44  ;;  %v649_v55 = vsub.f32 %v632_v28, %v642_v44 }
 0x404   :  { %v645_v45 = vpop.xlane.xlu0 %644 }
 0x405   :  { %v646_v47 = vmul.f32 0.03125, %v645_v45 }
 0x406   :  { %v782_v61 = vpop.permute.xlu1 %781 }
 0x407   :  { %v648_v48 = vsub.f32 %v646_v47, %v647_v46 }
 0x409   :  { %v650_v49 = vadd.f32 1e-05, %v648_v48 }
 0x40b   :  { %866 = vrsqrt.f32 %v650_v49 }
 0x40c   :  { %v775_v57 = vpop.permute.xlu0 %774 }
 0x40d   :  { %v865_v51 = vpop.eup %864 }
 0x40e   :  { %v770_v53 = vmul.f32 %v865_v51, %v767_v52 }
 0x410   :  { %v777_v58 = vmul.f32 %v775_v57, %v770_v53 }
 0x412   :  { %v784_v62 = vadd.f32 %v782_v61, %v777_v58 }
 0x415   :  { %v867_v56 = vpop.eup %866 }
 0x416   :  { %v652_v59 = vmul.f32 %v867_v56, %v649_v55 }
 0x418   :  { %v659_v60 = vmul.f32 %v657_v50, %v652_v59 }
 0x41a   :  { %v666_v63 = vadd.f32 %v664_v54, %v659_v60 }
 0x41c   :  { %v785_v3 = vadd.f32 %v784_v62, %v666_v63 }
 0x41e   :  { %v786_v4 = vmax.f32 %v785_v3, 0.0 }
 0x420   :  { %787 = vst [vmem:[#allocation2] sm:$0xff] %v786_v4 }
 0x421   :  { %879 = shalt.err (!%p876_p4)
}
 0x422   :  { %s880_s19 = scalar_lea.hbm %s1130_s15, 128 }
 0x423   :  { %p881_p5 = scmp.ne.s32.totalorder %s1130_s15, %s880_s19  ;;  %p884_p6 = scmp.lt.u32.totalorder %s880_s19, %s1130_s15 }
 0x425   :  { %p886_p7 = pnand %p884_p6, %p881_p5 }
 0x427   :  { %889 = shalt.err (!%p886_p7)
}
 0x428   :  { %797 = dma.vmem_to_hbm [thread:$0]  %s795_s10, 128, %s1130_s15, [#allocation3]  }
 0x429   :  { %890 = dma.done.wait [#allocation3], 128  }
 0x42a   :  { %891 = vsyncadd [#allocation3], 4294967168 }
 0x42b   :  { %801 = vsyncpa [#allocation3], 1 }

</bundles_post_ra>
